<compile_context>
chip_gen: v6e
topology: v6e:2x2x1
jax: 0.10.0
libtpu: 0.0.40
codegen_flags: <defaults>
</compile_context>

<pallas_src>
import functools
import math

import jax
import jax.numpy as jnp
from jax.experimental import pallas as pl
from jax.experimental.pallas import tpu as pltpu

BN_EPS = 1e-5  # torch.nn.BatchNorm1d default eps


def _round_up(n, m):
    return ((n + m - 1) // m) * m


# --------------------------------- kernel ----------------------------------- #
def _cell_kernel(gi_ref, ps_ref, h0_ref, w_hh_ref, w_preh_ref, w_heads_ref,
                 b_ref, out_ref, h_scr, *, H, heads_w):
    """One recurrent step; grid axis 0 = time (serial recurrence).

    gi_ref      (1, B, 3H)   f32  precomputed x @ W_ih + b_ih  (streamed)
    ps_ref      (1, B, P)    f32  precomputed [z|x|(y)] @ W_pre_static + b_pre
    h0_ref      (B, H)       f32  initial hidden state          (resident)
    w_hh_ref    (H, 3H)      mxu  GRU hidden weights            (resident)
    w_preh_ref  (H, P)       mxu  h_s rows of fused pre-linear  (resident)
    w_heads_ref (P, heads_w) mxu  block-diag heads, zero-padded (resident)
    b_ref       (2, BW)      f32  row 0: b_hh, row 1: b_heads   (resident)
    out_ref     (1, B, out_w)     [heads | h_s] lane-dense slab
    h_scr       (B, H)       f32  hidden state carried across grid steps
    """
    t = pl.program_id(0)

    @pl.when(t == 0)
    def _():
        h_scr[...] = h0_ref[...]

    h = h_scr[...]
    mxu = w_hh_ref.dtype

    # ---- GRU: only the h-dependent half (x half hoisted out of the loop) ---
    gi = gi_ref[0]
    gh = jnp.dot(h.astype(mxu), w_hh_ref[...],
                 preferred_element_type=jnp.float32) + b_ref[0:1, 0:3 * H]
    ru = jax.nn.sigmoid(gi[:, 0:2 * H] + gh[:, 0:2 * H])
    r = ru[:, 0:H]
    u = ru[:, H:2 * H]
    n = jnp.tanh(gi[:, 2 * H:3 * H] + r * gh[:, 2 * H:3 * H])
    h_s = (1.0 - u) * n + u * h
    h_scr[...] = h_s

    # ---- fused VAE pre-linear: static part precomputed, add h_s part -------
    pre = ps_ref[0] + jnp.dot(h_s.astype(mxu), w_preh_ref[...],
                              preferred_element_type=jnp.float32)

    # BatchNorm1d(affine=False, track_running_stats=False): batch statistics,
    # biased variance, strictly per feature column (valid for the fused
    # [post | prior] column layout).
    mean = jnp.mean(pre, axis=0, keepdims=True)
    var = jnp.mean(jnp.square(pre - mean), axis=0, keepdims=True)
    hz = jnp.tanh((pre - mean) * jax.lax.rsqrt(var + BN_EPS))

    # ---- mu/logvar heads: one block-diagonal matmul (columns pre-padded) ---
    heads = jnp.dot(hz.astype(mxu), w_heads_ref[...],
                    preferred_element_type=jnp.float32) + b_ref[1:2, 0:heads_w]

    # heads_w + H == out_w: single unmasked 128-lane store.
    out_ref[0] = jnp.concatenate([heads, h_s], axis=1).astype(out_ref.dtype)


# ------------------------- one-time parameter packing ----------------------- #
def pack_params(params, mxu_dtype=jnp.bfloat16):
    """Pack PyTorch-layout parameters once at load time. Weights consumed by
    the in-kernel (recurrent) matmuls are stored in `mxu_dtype`; weights used
    by the hoisted (h-independent) XLA matmuls stay f32."""
    f32 = jnp.float32
    w_ih = jnp.asarray(params["w_ih"], f32)        # (3H, D), gate order r,u,n
    w_hh = jnp.asarray(params["w_hh"], f32)        # (3H, H)
    H = w_hh.shape[1]
    D = w_ih.shape[1]
    w_post = jnp.asarray(params["w_post"], f32)    # (HZ, Z+D+H+Y)
    w_prior = jnp.asarray(params["w_prior"], f32)  # (HZ, Z+D+H)
    HZ = w_post.shape[0]
    Z = jnp.asarray(params["w_mu_prior"], f32).shape[0]
    Y = w_post.shape[1] - w_prior.shape[1]

    # GRU: x-part used by the hoisted precompute; h-part goes into the kernel.
    w_ih_t = w_ih.T                                # (D, 3H)  f32 (hoisted)
    b_ih = jnp.asarray(params["b_ih"], f32)
    w_hh_t = w_hh.T.astype(mxu_dtype)              # (H, 3H)  kernel-resident
    b_hh = jnp.asarray(params["b_hh"], f32)

    # VAE pre-linears: input layouts post=[z,x,h_s,y], prior=[z,x,h_s].
    # Split into static rows ([z|x|(y)], hoisted) and h_s rows (in-kernel).
    wp = w_post.T                                  # (Z+D+H+Y, HZ)
    wr = w_prior.T                                 # (Z+D+H,   HZ)
    zx = slice(0, Z + D)
    hsl = slice(Z + D, Z + D + H)
    ysl = slice(Z + D + H, Z + D + H + Y)

    # Post path fuses [post | prior] column-wise (prior branch ignores y).
    w_static_post = jnp.concatenate([
        jnp.concatenate([wp[zx], wp[ysl]], axis=0),                  # post cols
        jnp.concatenate([wr[zx], jnp.zeros((Y, HZ), f32)], axis=0),  # prior cols
    ], axis=1)                                                       # (Z+D+Y, 2HZ)
    b_pre_post = jnp.concatenate([jnp.asarray(params["b_post"], f32),
                                  jnp.asarray(params["b_prior"], f32)])
    w_preh_post = jnp.concatenate([wp[hsl], wr[hsl]], axis=1).astype(mxu_dtype)

    w_static_prior = wr[zx]                                          # (Z+D, HZ)
    b_pre_prior = jnp.asarray(params["b_prior"], f32)
    w_preh_prior = wr[hsl].astype(mxu_dtype)                         # (H, HZ)

    # Block-diagonal mu/sigma heads, zero-padded to out_w - H columns so the
    # kernel never materializes a zero pad.
    wmu_p = jnp.asarray(params["w_mu_post"], f32).T                  # (HZ, Z)
    wsg_p = jnp.asarray(params["w_sig_post"], f32).T
    wmu_r = jnp.asarray(params["w_mu_prior"], f32).T
    wsg_r = jnp.asarray(params["w_sig_prior"], f32).T

    out_w_post = _round_up(4 * Z + H, 128)
    heads_w_post = out_w_post - H
    out_w_prior = _round_up(2 * Z + H, 128)
    heads_w_prior = out_w_prior - H

    zero = jnp.zeros((HZ, 2 * Z), f32)
    w_heads_post = jnp.concatenate(
        [jnp.concatenate([wmu_p, wsg_p, zero], axis=1),
         jnp.concatenate([zero, wmu_r, wsg_r], axis=1)], axis=0)     # (2HZ, 4Z)
    w_heads_post = jnp.pad(
        w_heads_post, ((0, 0), (0, heads_w_post - 4 * Z))).astype(mxu_dtype)
    b_heads_post = jnp.concatenate(
        [jnp.asarray(params["b_mu_post"], f32),
         jnp.asarray(params["b_sig_post"], f32),
         jnp.asarray(params["b_mu_prior"], f32),
         jnp.asarray(params["b_sig_prior"], f32)])
    b_heads_post = jnp.pad(b_heads_post, (0, heads_w_post - 4 * Z))

    w_heads_prior = jnp.concatenate([wmu_r, wsg_r], axis=1)          # (HZ, 2Z)
    w_heads_prior = jnp.pad(
        w_heads_prior, ((0, 0), (0, heads_w_prior - 2 * Z))).astype(mxu_dtype)
    b_heads_prior = jnp.concatenate(
        [jnp.asarray(params["b_mu_prior"], f32),
         jnp.asarray(params["b_sig_prior"], f32)])
    b_heads_prior = jnp.pad(b_heads_prior, (0, heads_w_prior - 2 * Z))

    def bias_slab(rows):
        bw = _round_up(max(r.shape[0] for r in rows), 128)
        return jnp.stack([jnp.pad(r, (0, bw - r.shape[0])) for r in rows])

    return {
        "H": H, "Z": Z, "D": D, "HZ": HZ, "Y": Y,
        "w_ih_t": w_ih_t, "b_ih": b_ih, "w_hh_t": w_hh_t,
        "out_w_post": out_w_post, "heads_w_post": heads_w_post,
        "w_static_post": w_static_post, "b_pre_post": b_pre_post,
        "w_preh_post": w_preh_post, "w_heads_post": w_heads_post,
        "b_slab_post": bias_slab([b_hh, b_heads_post]),
        "out_w_prior": out_w_prior, "heads_w_prior": heads_w_prior,
        "w_static_prior": w_static_prior, "b_pre_prior": b_pre_prior,
        "w_preh_prior": w_preh_prior, "w_heads_prior": w_heads_prior,
        "b_slab_prior": bias_slab([b_hh, b_heads_prior]),
    }


# --------------------------------- wrappers ---------------------------------- #
def market_encoder_sequence(packed, x_seq, h0, z_seq, y_seq=None,
                            *, vmem_limit_bytes=32 * 1024 * 1024):
    """T recurrent MarketEncoderCell steps fused into one pallas_call.

    x_seq (T,B,D), h0 (B,H), z_seq (T,B,Z), y_seq (T,B,Y) or None.
    Returns the packed (T, B, out_w) output slab (see unpack_slab)."""
    f32 = jnp.float32
    T, B, _ = x_seq.shape
    H = packed["H"]

    x_seq = x_seq.astype(f32)
    z_seq = z_seq.astype(f32)
    h0 = h0.astype(f32)

    # h-independent matmuls hoisted out of the recurrence: one large batched
    # matmul each over all T*B rows (MXU-filling), done by XLA.
    gi = jnp.einsum("tbd,dg->tbg", x_seq, packed["w_ih_t"]) + packed["b_ih"]

    if y_seq is not None:
        y_h = y_seq.astype(jnp.float16).astype(f32)   # mimic y.half()
        feats = jnp.concatenate([z_seq, x_seq, y_h], axis=-1)
        w_static, b_pre = packed["w_static_post"], packed["b_pre_post"]
        w_preh, w_heads = packed["w_preh_post"], packed["w_heads_post"]
        b_slab = packed["b_slab_post"]
        out_w, heads_w = packed["out_w_post"], packed["heads_w_post"]
    else:
        feats = jnp.concatenate([z_seq, x_seq], axis=-1)
        w_static, b_pre = packed["w_static_prior"], packed["b_pre_prior"]
        w_preh, w_heads = packed["w_preh_prior"], packed["w_heads_prior"]
        b_slab = packed["b_slab_prior"]
        out_w, heads_w = packed["out_w_prior"], packed["heads_w_prior"]

    pre_static = jnp.einsum("tbf,fk->tbk", feats, w_static) + b_pre
    pre_w = w_static.shape[1]
    bias_w = b_slab.shape[1]

    kernel = functools.partial(_cell_kernel, H=H, heads_w=heads_w)

    slab = pl.pallas_call(
        kernel,
        out_shape=jax.ShapeDtypeStruct((T, B, out_w), f32),
        grid_spec=pltpu.PrefetchScalarGridSpec(
            num_scalar_prefetch=0,
            grid=(T,),
            in_specs=[
                # streamed per-step activations (auto double-buffered)
                pl.BlockSpec((1, B, 3 * H), lambda t: (t, 0, 0)),
                pl.BlockSpec((1, B, pre_w), lambda t: (t, 0, 0)),
                # resident operands: constant block index -> DMA'd once
                pl.BlockSpec((B, H), lambda t: (0, 0)),
                pl.BlockSpec((H, 3 * H), lambda t: (0, 0)),
                pl.BlockSpec((H, pre_w), lambda t: (0, 0)),
                pl.BlockSpec((pre_w, heads_w), lambda t: (0, 0)),
                pl.BlockSpec((2, bias_w), lambda t: (0, 0)),
            ],
            out_specs=pl.BlockSpec((1, B, out_w), lambda t: (t, 0, 0)),
            scratch_shapes=[pltpu.VMEM((B, H), f32)],
        ),
        compiler_params=pltpu.CompilerParams(
            dimension_semantics=("arbitrary",),     # serial recurrence over t
            vmem_limit_bytes=vmem_limit_bytes),
    )(gi, pre_static, h0, packed["w_hh_t"], w_preh, w_heads, b_slab)
    return slab


def unpack_slab(packed, slab, has_y, step=None):
    """Slice the packed slab into (u_prior, logvar_prior, u_post, logvar_post,
    h_s). Downstream code that can consume the packed layout should skip this."""
    Z, H = packed["Z"], packed["H"]
    hw = packed["heads_w_post"] if has_y else packed["heads_w_prior"]
    s = slab if step is None else slab[step]
    h_s = s[..., hw:hw + H]
    if has_y:
        return (s[..., 2 * Z:3 * Z], s[..., 3 * Z:4 * Z],
                s[..., 0:Z], s[..., Z:2 * Z], h_s)
    return s[..., 0:Z], s[..., Z:2 * Z], None, None, h_s


def market_encoder_cell(packed, x, h, z, y=None):
    """Single-step forward matching MarketEncoderCell.forward: returns
    (u_prior, logvar_prior, u_post, logvar_post, h_s); posterior outputs are
    None when y is None."""
    y_seq = None if y is None else y[None]
    slab = market_encoder_sequence(packed, x[None], h, z[None], y_seq)
    return unpack_slab(packed, slab, has_y=(y is not None), step=0)


# --------------------------- deterministic params ---------------------------- #
def init_params(key, input_size, h_s_size, h_z_size, z_size, y_size):
    ks = jax.random.split(key, 16)

    def unif(k, shape, bound):
        return jax.random.uniform(k, shape, jnp.float32, -bound, bound)

    def linear(k1, k2, fan_in, fan_out):
        b = 1.0 / math.sqrt(fan_in)
        return unif(k1, (fan_out, fan_in), b), unif(k2, (fan_out,), b)

    kg = 1.0 / math.sqrt(h_s_size)
    d_post = z_size + input_size + h_s_size + y_size
    d_prior = z_size + input_size + h_s_size

    p = {}
    p["w_ih"] = unif(ks[0], (3 * h_s_size, input_size), kg)
    p["w_hh"] = unif(ks[1], (3 * h_s_size, h_s_size), kg)
    p["b_ih"] = unif(ks[2], (3 * h_s_size,), kg)
    p["b_hh"] = unif(ks[3], (3 * h_s_size,), kg)
    p["w_post"], p["b_post"] = linear(ks[4], ks[5], d_post, h_z_size)
    p["w_mu_post"], p["b_mu_post"] = linear(ks[6], ks[7], h_z_size, z_size)
    p["w_sig_post"], p["b_sig_post"] = linear(ks[8], ks[9], h_z_size, z_size)
    p["w_prior"], p["b_prior"] = linear(ks[10], ks[11], d_prior, h_z_size)
    p["w_mu_prior"], p["b_mu_prior"] = linear(ks[12], ks[13], h_z_size, z_size)
    p["w_sig_prior"], p["b_sig_prior"] = linear(ks[14], ks[15], h_z_size, z_size)
    return p


# ----------------------------- pure-JAX reference ---------------------------- #
def reference(params, x, h, z, y):
    H = h.shape[1]
    gi = x @ params["w_ih"].T + params["b_ih"]
    gh = h @ params["w_hh"].T + params["b_hh"]
    r = jax.nn.sigmoid(gi[:, :H] + gh[:, :H])
    u = jax.nn.sigmoid(gi[:, H:2 * H] + gh[:, H:2 * H])
    n = jnp.tanh(gi[:, 2 * H:] + r * gh[:, 2 * H:])
    h_s = (1.0 - u) * n + u * h

    def branch(inp, w, b, wm, bm, ws, bs):
        pre = inp @ w.T + b
        mean = pre.mean(0, keepdims=True)
        var = ((pre - mean) ** 2).mean(0, keepdims=True)
        hz = jnp.tanh((pre - mean) / jnp.sqrt(var + BN_EPS))
        return hz @ wm.T + bm, hz @ ws.T + bs

    y_h = y.astype(jnp.float16).astype(jnp.float32)
    u_post, lv_post = branch(jnp.concatenate([z, x, h_s, y_h], 1),
                             params["w_post"], params["b_post"],
                             params["w_mu_post"], params["b_mu_post"],
                             params["w_sig_post"], params["b_sig_post"])
    u_prior, lv_prior = branch(jnp.concatenate([z, x, h_s], 1),
                               params["w_prior"], params["b_prior"],
                               params["w_mu_prior"], params["b_mu_prior"],
                               params["w_sig_prior"], params["b_sig_prior"])
    return u_prior, lv_prior, u_post, lv_post, h_s


def reference_sequence(params, x_seq, h0, z_seq, y_seq):
    h = h0
    cols = [[], [], [], [], []]
    for t in range(x_seq.shape[0]):
        outs = reference(params, x_seq[t], h, z_seq[t], y_seq[t])
        h = outs[4]
        for c, o in zip(cols, outs):
            c.append(o)
    return tuple(jnp.stack(c, axis=0) for c in cols)


# ----------------------------------- main ------------------------------------ #
if __name__ == "__main__":
    # small shapes: seq=8, batch=8, input=16, h_s=32, h_z=32, z=8, y=8
    T, B, D_IN, H_S, H_Z, Z_S, Y_S = 8, 8, 16, 32, 32, 8, 8

    key = jax.random.PRNGKey(0)
    kp, kx, kh, kz, ky = jax.random.split(key, 5)
    params = init_params(kp, D_IN, H_S, H_Z, Z_S, Y_S)

    x_seq = jax.random.normal(kx, (T, B, D_IN), jnp.float32)
    h0 = jax.random.normal(kh, (B, H_S), jnp.float32)
    z_seq = jax.random.normal(kz, (T, B, Z_S), jnp.float32)
    y_seq = jax.random.normal(ky, (T, B, Y_S), jnp.float32)

    names = ("u_prior", "logvar_prior", "u_post", "logvar_post", "h_s")

    # ---- exact-path checks: f32 MXU operands, tight tolerance --------------
    packed_f32 = pack_params(params, mxu_dtype=jnp.float32)

    # single-step module forward (y provided)
    outs = jax.block_until_ready(
        market_encoder_cell(packed_f32, x_seq[0], h0, z_seq[0], y_seq[0]))
    ref = reference(params, x_seq[0], h0, z_seq[0], y_seq[0])
    for nme, o, r in zip(names, outs, ref):
        assert o.shape == r.shape, (nme, o.shape, r.shape)
        assert jnp.allclose(o, r, atol=2e-3, rtol=2e-3), (
            nme, float(jnp.max(jnp.abs(o - r))))

    # single-step, y=None (prior-only path; posterior outputs are None)
    outs_p = market_encoder_cell(packed_f32, x_seq[0], h0, z_seq[0], None)
    jax.block_until_ready((outs_p[0], outs_p[1], outs_p[4]))
    assert outs_p[2] is None and outs_p[3] is None
    for o, r in ((outs_p[0], ref[0]), (outs_p[1], ref[1]), (outs_p[4], ref[4])):
        assert jnp.allclose(o, r, atol=2e-3, rtol=2e-3), float(
            jnp.max(jnp.abs(o - r)))

    # full T-step sequence fused into one pallas_call (f32 path)
    slab = jax.block_until_ready(
        market_encoder_sequence(packed_f32, x_seq, h0, z_seq, y_seq))
    seq_out = unpack_slab(packed_f32, slab, has_y=True)
    ref_seq = reference_sequence(params, x_seq, h0, z_seq, y_seq)
    for nme, o, r in zip(names, seq_out, ref_seq):
        assert o.shape == r.shape, (nme, o.shape, r.shape)
        assert jnp.allclose(o, r, atol=5e-3, rtol=5e-3), (
            nme, float(jnp.max(jnp.abs(o - r))))

    # ---- perf-default path: bf16 MXU operands, f32 accumulation/elementwise -
    packed_bf16 = pack_params(params)  # mxu_dtype=bfloat16
    slab_bf = jax.block_until_ready(
        market_encoder_sequence(packed_bf16, x_seq, h0, z_seq, y_seq))
    seq_bf = unpack_slab(packed_bf16, slab_bf, has_y=True)
    for nme, o, r in zip(names, seq_bf, ref_seq):
        assert jnp.allclose(o, r, atol=6e-2, rtol=6e-2), (
            nme, float(jnp.max(jnp.abs(o - r))))

    print("KERNEL_OK")
</pallas_src>

<mosaic_0001>
module attributes {stable_mosaic.version = 11 : i64} {
  func.func @_cell_kernel(%arg0: i32, %arg1: memref<1x8x96xf32, #tpu.memory_space<vmem>>, %arg2: memref<1x8x64xf32, #tpu.memory_space<vmem>>, %arg3: memref<8x32xf32, #tpu.memory_space<vmem>>, %arg4: memref<32x96xf32, #tpu.memory_space<vmem>>, %arg5: memref<32x64xf32, #tpu.memory_space<vmem>>, %arg6: memref<64x96xf32, #tpu.memory_space<vmem>>, %arg7: memref<2x128xf32, #tpu.memory_space<vmem>>, %arg8: memref<1x8x128xf32, #tpu.memory_space<vmem>>, %arg9: memref<8x32xf32, #tpu.memory_space<vmem>>) attributes {dimension_semantics = [#tpu.dimension_semantics<arbitrary>], iteration_bounds = array<i64: 1>, scalar_prefetch = 0 : i64, scratch_operands = 1 : i64, tpu.core_type = #tpu.core_type<tc>, window_params = [{transform_indices = @transform_0, window_bounds = array<i64: 1, 8, 96>}, {transform_indices = @transform_1, window_bounds = array<i64: 1, 8, 64>}, {pipeline_mode = #tpu.pipeline_mode<synchronous>, transform_indices = @transform_2, window_bounds = array<i64: 8, 32>}, {pipeline_mode = #tpu.pipeline_mode<synchronous>, transform_indices = @transform_3, window_bounds = array<i64: 32, 96>}, {pipeline_mode = #tpu.pipeline_mode<synchronous>, transform_indices = @transform_4, window_bounds = array<i64: 32, 64>}, {pipeline_mode = #tpu.pipeline_mode<synchronous>, transform_indices = @transform_5, window_bounds = array<i64: 64, 96>}, {pipeline_mode = #tpu.pipeline_mode<synchronous>, transform_indices = @transform_6, window_bounds = array<i64: 2, 128>}, {transform_indices = @transform_7, window_bounds = array<i64: 1, 8, 128>}]} {
    %c0_i32 = arith.constant 0 : i32
    %0 = arith.cmpi eq, %arg0, %c0_i32 : i32
    %1 = arith.extui %0 : i1 to i32
    %c0_i32_0 = arith.constant 0 : i32
    %2 = arith.cmpi ne, %1, %c0_i32_0 : i32
    scf.if %2 {
      %c0_31 = arith.constant 0 : index
      %c0_32 = arith.constant 0 : index
      %65 = vector.load %arg3[%c0_31, %c0_32] : memref<8x32xf32, #tpu.memory_space<vmem>>, vector<8x32xf32>
      %c0_33 = arith.constant 0 : index
      %c0_34 = arith.constant 0 : index
      %66 = vector.load %arg9[%c0_33, %c0_34] : memref<8x32xf32, #tpu.memory_space<vmem>>, vector<8x32xf32>
      tpu.vector_store %arg9[%c0_33, %c0_34], %65 {strides = array<i32>} : memref<8x32xf32, #tpu.memory_space<vmem>>, vector<8x32xf32>,
    } else {
    }
    %c0 = arith.constant 0 : index
    %c0_1 = arith.constant 0 : index
    %3 = vector.load %arg9[%c0, %c0_1] : memref<8x32xf32, #tpu.memory_space<vmem>>, vector<8x32xf32>
    %c0_2 = arith.constant 0 : index
    %c0_3 = arith.constant 0 : index
    %c0_4 = arith.constant 0 : index
    %4 = vector.load %arg1[%c0_2, %c0_3, %c0_4] : memref<1x8x96xf32, #tpu.memory_space<vmem>>, vector<1x8x96xf32>
    %5 = vector.shape_cast %4 : vector<1x8x96xf32> to vector<8x96xf32>
    %c0_5 = arith.constant 0 : index
    %c0_6 = arith.constant 0 : index
    %6 = vector.load %arg4[%c0_5, %c0_6] : memref<32x96xf32, #tpu.memory_space<vmem>>, vector<32x96xf32>
    %cst = arith.constant dense<0.000000e+00> : vector<8x96xf32>
    %7 = tpu.matmul %3, %6, %cst {dimension_numbers = #tpu.dot_dimension_numbers<[1], [0], [0], [1], [0, 0, 1, 1], [], []>} : vector<8x32xf32>, vector<32x96xf32>, vector<8x96xf32> -> vector<8x96xf32>
    %c0_7 = arith.constant 0 : index
    %c0_8 = arith.constant 0 : index
    %8 = vector.load %arg7[%c0_7, %c0_8] : memref<2x128xf32, #tpu.memory_space<vmem>>, vector<1x96xf32>
    %9 = vector.broadcast %8 : vector<1x96xf32> to vector<8x96xf32>
    %10 = arith.addf %7, %9 : vector<8x96xf32>
    %11 = vector.extract_strided_slice %5 {offsets = [0, 0], sizes = [8, 64], strides = [1, 1]} : vector<8x96xf32> to vector<8x64xf32>
    %12 = vector.extract_strided_slice %10 {offsets = [0, 0], sizes = [8, 64], strides = [1, 1]} : vector<8x96xf32> to vector<8x64xf32>
    %13 = arith.addf %11, %12 : vector<8x64xf32>
    %14 = arith.negf %13 : vector<8x64xf32>
    %15 = math.exp %14 : vector<8x64xf32>
    %cst_9 = arith.constant 1.000000e+00 : f32
    %16 = vector.broadcast %cst_9 : f32 to vector<8x64xf32>
    %17 = arith.addf %16, %15 : vector<8x64xf32>
    %18 = arith.divf %16, %17 : vector<8x64xf32>
    %19 = vector.extract_strided_slice %18 {offsets = [0, 0], sizes = [8, 32], strides = [1, 1]} : vector<8x64xf32> to vector<8x32xf32>
    %20 = vector.extract_strided_slice %18 {offsets = [0, 32], sizes = [8, 32], strides = [1, 1]} : vector<8x64xf32> to vector<8x32xf32>
    %21 = vector.extract_strided_slice %5 {offsets = [0, 64], sizes = [8, 32], strides = [1, 1]} : vector<8x96xf32> to vector<8x32xf32>
    %22 = vector.extract_strided_slice %10 {offsets = [0, 64], sizes = [8, 32], strides = [1, 1]} : vector<8x96xf32> to vector<8x32xf32>
    %23 = arith.mulf %19, %22 : vector<8x32xf32>
    %24 = arith.addf %21, %23 : vector<8x32xf32>
    %25 = math.tanh %24 : vector<8x32xf32>
    %cst_10 = arith.constant 1.000000e+00 : f32
    %26 = vector.broadcast %cst_10 : f32 to vector<8x32xf32>
    %27 = arith.subf %26, %20 : vector<8x32xf32>
    %28 = arith.mulf %27, %25 : vector<8x32xf32>
    %29 = arith.mulf %20, %3 : vector<8x32xf32>
    %30 = arith.addf %28, %29 : vector<8x32xf32>
    %c0_11 = arith.constant 0 : index
    %c0_12 = arith.constant 0 : index
    %31 = vector.load %arg9[%c0_11, %c0_12] : memref<8x32xf32, #tpu.memory_space<vmem>>, vector<8x32xf32>
    tpu.vector_store %arg9[%c0_11, %c0_12], %30 {strides = array<i32>} : memref<8x32xf32, #tpu.memory_space<vmem>>, vector<8x32xf32>,
    %c0_13 = arith.constant 0 : index
    %c0_14 = arith.constant 0 : index
    %c0_15 = arith.constant 0 : index
    %32 = vector.load %arg2[%c0_13, %c0_14, %c0_15] : memref<1x8x64xf32, #tpu.memory_space<vmem>>, vector<1x8x64xf32>
    %33 = vector.shape_cast %32 : vector<1x8x64xf32> to vector<8x64xf32>
    %c0_16 = arith.constant 0 : index
    %c0_17 = arith.constant 0 : index
    %34 = vector.load %arg5[%c0_16, %c0_17] : memref<32x64xf32, #tpu.memory_space<vmem>>, vector<32x64xf32>
    %cst_18 = arith.constant dense<0.000000e+00> : vector<8x64xf32>
    %35 = tpu.matmul %30, %34, %cst_18 {dimension_numbers = #tpu.dot_dimension_numbers<[1], [0], [0], [1], [0, 0, 1, 1], [], []>} : vector<8x32xf32>, vector<32x64xf32>, vector<8x64xf32> -> vector<8x64xf32>
    %36 = arith.addf %33, %35 : vector<8x64xf32>
    %cst_19 = arith.constant dense<0.000000e+00> : vector<64xf32>
    %37 = vector.multi_reduction <add>, %36, %cst_19 [0] : vector<8x64xf32> to vector<64xf32>
    %38 = vector.shape_cast %37 : vector<64xf32> to vector<1x64xf32>
    %cst_20 = arith.constant 8.000000e+00 : f32
    %39 = vector.broadcast %cst_20 : f32 to vector<1x64xf32>
    %40 = arith.divf %38, %39 : vector<1x64xf32>
    %41 = vector.broadcast %40 : vector<1x64xf32> to vector<8x64xf32>
    %42 = arith.subf %36, %41 : vector<8x64xf32>
    %43 = arith.mulf %42, %42 : vector<8x64xf32>
    %cst_21 = arith.constant dense<0.000000e+00> : vector<64xf32>
    %44 = vector.multi_reduction <add>, %43, %cst_21 [0] : vector<8x64xf32> to vector<64xf32>
    %45 = vector.shape_cast %44 : vector<64xf32> to vector<1x64xf32>
    %cst_22 = arith.constant 8.000000e+00 : f32
    %46 = vector.broadcast %cst_22 : f32 to vector<1x64xf32>
    %47 = arith.divf %45, %46 : vector<1x64xf32>
    %48 = vector.broadcast %40 : vector<1x64xf32> to vector<8x64xf32>
    %49 = arith.subf %36, %48 : vector<8x64xf32>
    %cst_23 = arith.constant 9.99999974E-6 : f32
    %50 = vector.broadcast %cst_23 : f32 to vector<1x64xf32>
    %51 = arith.addf %47, %50 : vector<1x64xf32>
    %52 = math.rsqrt %51 : vector<1x64xf32>
    %53 = vector.broadcast %52 : vector<1x64xf32> to vector<8x64xf32>
    %54 = arith.mulf %49, %53 : vector<8x64xf32>
    %55 = math.tanh %54 : vector<8x64xf32>
    %c0_24 = arith.constant 0 : index
    %c0_25 = arith.constant 0 : index
    %56 = vector.load %arg6[%c0_24, %c0_25] : memref<64x96xf32, #tpu.memory_space<vmem>>, vector<64x96xf32>
    %cst_26 = arith.constant dense<0.000000e+00> : vector<8x96xf32>
    %57 = tpu.matmul %55, %56, %cst_26 {dimension_numbers = #tpu.dot_dimension_numbers<[1], [0], [0], [1], [0, 0, 1, 1], [], []>} : vector<8x64xf32>, vector<64x96xf32>, vector<8x96xf32> -> vector<8x96xf32>
    %c1 = arith.constant 1 : index
    %c0_27 = arith.constant 0 : index
    %58 = vector.load %arg7[%c1, %c0_27] : memref<2x128xf32, #tpu.memory_space<vmem>>, vector<1x96xf32>
    %59 = vector.broadcast %58 : vector<1x96xf32> to vector<8x96xf32>
    %60 = arith.addf %57, %59 : vector<8x96xf32>
    %61 = tpu.concatenate %60, %30 in 1 : vector<8x96xf32>, vector<8x32xf32> -> vector<8x128xf32>
    %c0_28 = arith.constant 0 : index
    %c0_29 = arith.constant 0 : index
    %c0_30 = arith.constant 0 : index
    %62 = vector.load %arg8[%c0_28, %c0_29, %c0_30] : memref<1x8x128xf32, #tpu.memory_space<vmem>>, vector<1x8x128xf32>
    %63 = vector.shape_cast %62 : vector<1x8x128xf32> to vector<8x128xf32>
    %64 = vector.shape_cast %61 : vector<8x128xf32> to vector<1x8x128xf32>
    tpu.vector_store %arg8[%c0_28, %c0_29, %c0_30], %64 {strides = array<i32>} : memref<1x8x128xf32, #tpu.memory_space<vmem>>, vector<1x8x128xf32>,
    return
  }
  func.func @transform_0(%arg0: i32) -> (i32, i32, i32) {
    %c0_i32 = arith.constant 0 : i32
    %c0_i32_0 = arith.constant 0 : i32
    %c0_i32_1 = arith.constant 0 : i32
    return %arg0, %c0_i32, %c0_i32_0 : i32, i32, i32
  }
  func.func @transform_1(%arg0: i32) -> (i32, i32, i32) {
    %c0_i32 = arith.constant 0 : i32
    %c0_i32_0 = arith.constant 0 : i32
    %c0_i32_1 = arith.constant 0 : i32
    return %arg0, %c0_i32, %c0_i32_0 : i32, i32, i32
  }
  func.func @transform_2(%arg0: i32) -> (i32, i32) {
    %c0_i32 = arith.constant 0 : i32
    %c0_i32_0 = arith.constant 0 : i32
    %c0_i32_1 = arith.constant 0 : i32
    return %c0_i32, %c0_i32_0 : i32, i32
  }
  func.func @transform_3(%arg0: i32) -> (i32, i32) {
    %c0_i32 = arith.constant 0 : i32
    %c0_i32_0 = arith.constant 0 : i32
    %c0_i32_1 = arith.constant 0 : i32
    return %c0_i32, %c0_i32_0 : i32, i32
  }
  func.func @transform_4(%arg0: i32) -> (i32, i32) {
    %c0_i32 = arith.constant 0 : i32
    %c0_i32_0 = arith.constant 0 : i32
    %c0_i32_1 = arith.constant 0 : i32
    return %c0_i32, %c0_i32_0 : i32, i32
  }
  func.func @transform_5(%arg0: i32) -> (i32, i32) {
    %c0_i32 = arith.constant 0 : i32
    %c0_i32_0 = arith.constant 0 : i32
    %c0_i32_1 = arith.constant 0 : i32
    return %c0_i32, %c0_i32_0 : i32, i32
  }
  func.func @transform_6(%arg0: i32) -> (i32, i32) {
    %c0_i32 = arith.constant 0 : i32
    %c0_i32_0 = arith.constant 0 : i32
    %c0_i32_1 = arith.constant 0 : i32
    return %c0_i32, %c0_i32_0 : i32, i32
  }
  func.func @transform_7(%arg0: i32) -> (i32, i32, i32) {
    %c0_i32 = arith.constant 0 : i32
    %c0_i32_0 = arith.constant 0 : i32
    %c0_i32_1 = arith.constant 0 : i32
    return %arg0, %c0_i32, %c0_i32_0 : i32, i32, i32
  }
}

</mosaic_0001>

<bundles_post_ra>
// kernel: tpu_custom_call.1
= control target key start
LH: loop header
LB: loop body
LE: loop exit
PB: predicated region body
PF: predicated region fallthrough
CT: control target
= control target key end

     0   :  { %12 = vsyncpa [#allocation4], 0  ;;  %s803_s0 = inlined_call_operand.hbm [shape: f32[1,8,96], index: 0, kind: input, shape index: {}]   ;;  %s804_s1 = inlined_call_operand.hbm [shape: f32[1,8,64], index: 1, kind: input, shape index: {}]   ;;  %s805_s2 = inlined_call_operand.hbm [shape: f32[8,32], index: 2, kind: input, shape index: {}]   ;;  %s806_s3 = inlined_call_operand.hbm [shape: f32[32,96], index: 3, kind: input, shape index: {}]   ;;  %s807_s4 = inlined_call_operand.hbm [shape: f32[32,64], index: 4, kind: input, shape index: {}]   ;;  %s808_s5 = inlined_call_operand.hbm [shape: f32[64,96], index: 5, kind: input, shape index: {}]   ;;  %s809_s6 = inlined_call_operand.vmem [shape: f32[2,128], index: 6, kind: input, shape index: {}]   ;;  %s810_s7 = inlined_call_operand.hbm [shape: f32[1,8,128], index: 7, kind: output, shape index: {}]  }
   0x1   :  { %13 = vsyncpa [#allocation7], 0 }
   0x2   :  { %14 = vsyncpa [#allocation10], 0 }
   0x3   :  { %15 = vsyncpa [#allocation13], 0 }
   0x4   :  { %16 = vsyncpa [#allocation5], 0  ;;  %s681_s24 = smov [#allocation6]   ;;  %s682_s26 = smov [#allocation9]  }
   0x5   :  { %s33_s25 = sshll.u32 %s681_s24, 4  ;;  %s52_s27 = sshll.u32 %s682_s26, 4  ;;  %s34_s25 = int_to_ptr.vmem [resolvable:$true] %s33_s25  ;;  %s53_s27 = int_to_ptr.vmem [resolvable:$true] %s52_s27 }
   0x6   :  { %s539_s28 = scalar_lea.vmem %s34_s25, 128  ;;  %p544_p1 = scmp.lt.s32.totalorder %s34_s25, %s34_s25 }
   0x7   :  { %p540_p0 = scmp.ne.s32.totalorder %s34_s25, %s539_s28  ;;  %p545_p2 = scmp.lt.s32.totalorder %s539_s28, %s539_s28 }
   0x9   :  { %p546_p3 = por %p545_p2, %p544_p1 }
   0xb   :  { %p547_p4 = pnand %p546_p3, %p540_p0 }
   0xd   :  { %550 = shalt.err (!%p547_p4)
}
   0xe   :  { %36 = dma.hbm_to_vmem [thread:$0]  %s804_s1, 128, %s34_s25, [#allocation7]  }
   0xf   :  { %s559_s8 = scalar_lea.vmem %s53_s27, 512  ;;  %p564_p6 = scmp.lt.s32.totalorder %s53_s27, %s53_s27 }
  0x10   :  { %p560_p5 = scmp.ne.s32.totalorder %s53_s27, %s559_s8  ;;  %p565_p7 = scmp.lt.s32.totalorder %s559_s8, %s559_s8 }
  0x12   :  { %p566_p8 = por %p565_p7, %p564_p6 }
  0x14   :  { %p567_p9 = pnand %p566_p8, %p560_p5 }
  0x16   :  { %570 = shalt.err (!%p567_p9)
}
  0x17   :  { %s683_s9 = smov 128   ;;  %s684_s10 = smov 8  }
  0x18   :  { %58 = dma.hbm_to_vmem [thread:$0]  %s806_s3, 512, %s53_s27, [#allocation10], %s683_s9, %s683_s9, %s684_s10  }
  0x19   :  { %s685_s13 = smov [#allocation3]   ;;  %s686_s15 = smov [#allocation8]  }
  0x1a   :  { %s23_s14 = sshll.u32 %s685_s13, 4  ;;  %s43_s1 = sshll.u32 %s686_s15, 4  ;;  %s24_s14 = int_to_ptr.vmem [resolvable:$true] %s23_s14  ;;  %s44_s1 = int_to_ptr.vmem [resolvable:$true] %s43_s1 }
  0x1b   :  { %s579_s16 = scalar_lea.vmem %s24_s14, 128  ;;  %p584_p11 = scmp.lt.s32.totalorder %s24_s14, %s24_s14 }
  0x1c   :  { %p580_p10 = scmp.ne.s32.totalorder %s24_s14, %s579_s16  ;;  %p585_p12 = scmp.lt.s32.totalorder %s579_s16, %s579_s16 }
  0x1e   :  { %p586_p13 = por %p585_p12, %p584_p11 }
  0x20   :  { %p587_p0 = pnand %p586_p13, %p580_p10 }
  0x22   :  { %590 = shalt.err (!%p587_p0)
}
  0x23   :  { %26 = dma.hbm_to_vmem [thread:$0]  %s803_s0, 128, %s24_s14, [#allocation4]  }
  0x24   :  { %s599_s19 = scalar_lea.vmem %s44_s1, 128  ;;  %p604_p2 = scmp.lt.s32.totalorder %s44_s1, %s44_s1 }
  0x25   :  { %p600_p1 = scmp.ne.s32.totalorder %s44_s1, %s599_s19  ;;  %p605_p3 = scmp.lt.s32.totalorder %s599_s19, %s599_s19 }
  0x27   :  { %p606_p4 = por %p605_p3, %p604_p2 }
  0x29   :  { %p607_p5 = pnand %p606_p4, %p600_p1 }
  0x2b   :  { %610 = shalt.err (!%p607_p5)
}
  0x2c   :  { %46 = dma.hbm_to_vmem [thread:$0]  %s805_s2, 128, %s44_s1, [#allocation7]  }
  0x2d   :  { %s687_s21 = smov [#allocation11]   ;;  %s688_s23 = smov [#allocation12]  }
  0x2e   :  { %s64_s22 = sshll.u32 %s687_s21, 4  ;;  %s76_s24 = sshll.u32 %s688_s23, 4  ;;  %s65_s22 = int_to_ptr.vmem [resolvable:$true] %s64_s22  ;;  %s77_s24 = int_to_ptr.vmem [resolvable:$true] %s76_s24 }
  0x2f   :  { %s619_s25 = scalar_lea.vmem %s65_s22, 512  ;;  %p624_p7 = scmp.lt.s32.totalorder %s65_s22, %s65_s22 }
  0x30   :  { %p620_p6 = scmp.ne.s32.totalorder %s65_s22, %s619_s25  ;;  %p625_p8 = scmp.lt.s32.totalorder %s619_s25, %s619_s25 }
  0x32   :  { %p626_p9 = por %p625_p8, %p624_p7 }
  0x34   :  { %p627_p10 = pnand %p626_p9, %p620_p6 }
  0x36   :  { %630 = shalt.err (!%p627_p10)
}
  0x37   :  { %70 = dma.hbm_to_vmem [thread:$0]  %s807_s4, 512, %s65_s22, [#allocation10], %s683_s9, %s683_s9, %s684_s10  }
  0x38   :  { %s639_s2 = scalar_lea.vmem %s77_s24, 1024  ;;  %p644_p12 = scmp.lt.s32.totalorder %s77_s24, %s77_s24 }
  0x39   :  { %p640_p11 = scmp.ne.s32.totalorder %s77_s24, %s639_s2  ;;  %p645_p13 = scmp.lt.s32.totalorder %s639_s2, %s639_s2 }
  0x3b   :  { %p646_p0 = por %p645_p13, %p644_p12 }
  0x3d   :  { %p647_p1 = pnand %p646_p0, %p640_p11 }
  0x3f   :  { %650 = shalt.err (!%p647_p1)
}
  0x40   :  { %82 = dma.hbm_to_vmem [thread:$0]  %s808_s5, 1024, %s77_s24, [#allocation13], %s683_s9, %s683_s9, %s684_s10  }
  0x41   :  { %671 = dma.done.wait [#allocation4], 128  }
  0x42   :  { %672 = vsyncadd [#allocation4], 4294967168 }
  0x43   :  { %673 = dma.done.wait [#allocation7], 256  }
  0x44   :  { %674 = vsyncadd [#allocation7], 4294967040 }
  0x45   :  { %675 = dma.done.wait [#allocation10], 1024  }
  0x46   :  { %676 = vsyncadd [#allocation10], 4294966272 }
  0x47   :  { %677 = dma.done.wait [#allocation13], 1024  }
  0x48   :  { %678 = vsyncadd [#allocation13], 4294966272  ;;  %v689_v0 = vmov 0.0   ;;  %vm690_vm0 = vmmov 0   ;;  %vm108_vm1 = vcmask 261120   ;;  %v115_v1 = vld [vmem:[#allocation9 + $0x18] sm:$0xff] }
  0x49   :  { %466 = vmatprep.subr.mxu1 %v689_v0  ;;  %474 = vmatprep.mubr.msk.f32.mxu1 %vm690_vm0, %v689_v0  ;;  %v114_v2 = vld [vmem:[#allocation9 + $0x10] sm:$0xff]  ;;  %v107_v3 = vld [vmem:[#allocation8] sm:$0xff]  ;;  %v113_v4 = vld [vmem:[#allocation9 + $0x8] sm:$0xff]  ;;  %s691_s29 = smov 64   ;;  %s692_s30 = smov 96   ;;  %vm307_vm2 = vcmask 523264  }
  0x4a   :  { %488 = vmatprep.subr.mxu0 %v689_v0  ;;  %504 = vmatprep.mubr.msk.f32.mxu0 %vm690_vm0, %v689_v0  ;;  %109 = vst.msk [vmem:[#allocation2] sm:$0xff] %vm108_vm1, %v107_v3  ;;  %v112_v5 = vld [vmem:[#allocation9] sm:$0xff]  ;;  %v111_v11 = vld [vmem:[#allocation3] sm:$0xff]  ;;  %v233_v21 = vld [vmem:[#allocation11 + $0x18] sm:$0xff]  ;;  %s693_s8 = smov 32   ;;  %s694_s11 = smov [#allocation14]  }
  0x4b   :  { %467 = vmatpush3.msra.mxu1 %v115_v1  ;;  %v441_v7 = vld [vmem:[%s809_s6] ss:$0 sm:$0xff]  ;;  %v232_v22 = vld [vmem:[#allocation11 + $0x10] sm:$0xff]  ;;  %v231_v23 = vld [vmem:[#allocation11 + $0x8] sm:$0xff]  ;;  %s429_s12 = sshll.u32 %s694_s11, 4  ;;  %vm420_vm3 = vcmask 785408   ;;  %s430_s12 = int_to_ptr.vmem [resolvable:$true] %s429_s12 }
  0x4c   :  { %468 = vmatprep.subr.mxu1 %v689_v0  ;;  %v230_v25 = vld [vmem:[#allocation11] sm:$0xff]  ;;  %v338_v33 = vld [vmem:[#allocation12 + $0x38] sm:$0xff]  ;;  %v337_v34 = vld [vmem:[#allocation12 + $0x30] sm:$0xff]  ;;  %s651_s13 = scalar_lea.vmem %s430_s12, 128  ;;  %p656_p3 = scmp.lt.s32.totalorder %s430_s12, %s430_s12 }
  0x4d   :  { %469 = vmatpush3.msra.mxu1 %v114_v2  ;;  %489 = vmatpush3.msra.mxu0 %v338_v33  ;;  %v336_v35 = vld [vmem:[#allocation12 + $0x28] sm:$0xff]  ;;  %v335_v36 = vld [vmem:[#allocation12 + $0x20] sm:$0xff]  ;;  %v334_v37 = vld [vmem:[#allocation12 + $0x18] sm:$0xff]  ;;  %p652_p2 = scmp.ne.s32.totalorder %s430_s12, %s651_s13  ;;  %p657_p4 = scmp.lt.s32.totalorder %s651_s13, %s651_s13 }
  0x4e   :  { %470 = vmatprep.subr.mxu1 %v689_v0  ;;  %490 = vmatprep.subr.mxu0 %v689_v0  ;;  %v333_v38 = vld [vmem:[#allocation12 + $0x10] sm:$0xff]  ;;  %v332_v39 = vld [vmem:[#allocation12 + $0x8] sm:$0xff]  ;;  %v331_v40 = vld [vmem:[#allocation12] sm:$0xff] }
  0x4f   :  { %471 = vmatpush3.msra.mxu1 %v113_v4  ;;  %491 = vmatpush3.msra.mxu0 %v337_v34  ;;  %v229_v41 = vld [vmem:[#allocation6] sm:$0xff]  ;;  %v445_v3 = vld [vmem:[%s809_s6 + $0x1] ss:$0 sm:$0xff]  ;;  %p658_p5 = por %p657_p4, %p656_p3 }
  0x50   :  { %472 = vmatprep.subr.mxu1 %v689_v0  ;;  %492 = vmatprep.subr.mxu0 %v689_v0 }
  0x51   :  { %473 = vmatpush3.msra.mxu1 %v112_v5  ;;  %v110_v6 = vld [vmem:[#allocation2] sm:$0xff]  ;;  %493 = vmatpush3.msra.mxu0 %v336_v35  ;;  %p659_p6 = pnand %p658_p5, %p652_p2 }
  0x52   :  { %477 = vmatprep.subr.mxu1 %v689_v0  ;;  %475 = vmatmul.mubr.msk.f32.vlgmr.msra.gmra.mxu1 %vm108_vm1, %v110_v6 }
  0x53   :  { %485 = vmatprep.mubr.msk.f32.mxu1 %vm690_vm0, %v689_v0  ;;  %478 = vmatpush3.msra.mxu1 %v233_v21 }
  0x54   :  { %479 = vmatprep.subr.mxu1 %v689_v0  ;;  %494 = vmatprep.subr.mxu0 %v689_v0 }
  0x55   :  { %480 = vmatpush3.msra.mxu1 %v232_v22  ;;  %495 = vmatpush3.msra.mxu0 %v335_v36 }
  0x56   :  { %481 = vmatprep.subr.mxu1 %v689_v0  ;;  %496 = vmatprep.subr.mxu0 %v689_v0 }
  0x57   :  { %482 = vmatpush3.msra.mxu1 %v231_v23  ;;  %497 = vmatpush3.msra.mxu0 %v334_v37 }
  0x58   :  { %483 = vmatprep.subr.mxu1 %v689_v0  ;;  %498 = vmatprep.subr.mxu0 %v689_v0 }
  0x59   :  { %484 = vmatpush3.msra.mxu1 %v230_v25  ;;  %499 = vmatpush3.msra.mxu0 %v333_v38 }
  0x5a   :  { %500 = vmatprep.subr.mxu0 %v689_v0 }
  0x5b   :  { %501 = vmatpush3.msra.mxu0 %v332_v39 }
  0x5c   :  { %502 = vmatprep.subr.mxu0 %v689_v0 }
  0x5d   :  { %503 = vmatpush3.msra.mxu0 %v331_v40 }
 0x112   :  { %v191_v8 = vpop.f32.mrf.mxu1 }
 0x113   :  { %v192_v9 = vadd.f32 %v441_v7, %v191_v8 }
 0x114   :  { %v476_v10 = vpop.f32.mrf.mxu1 }
 0x115   :  { %203 = vrot.lane.b32.xlu0 %v192_v9, %s691_s29  ;;  %v195_v12 = vadd.f32 %v192_v9, %v111_v11 }
 0x117   :  { %v443_v13 = vmul.f32 -1.442695, %v195_v12 }
 0x119   :  { %521 = vpow2.f32 %v443_v13 }
 0x126   :  { %v522_v14 = vpop.eup %521 }
 0x127   :  { %v199_v15 = vadd.f32 1.0, %v522_v14 }
 0x129   :  { %523 = vrcp.f32 %v199_v15 }
 0x136   :  { %v524_v16 = vpop.eup %523 }
 0x137   :  { %v213_v27 = vsub.f32 1.0, %v524_v16 }
 0x187   :  { %v204_v17 = vpop.permute.xlu0 %203 }
 0x188   :  { %v206_v18 = vmul.f32 %v524_v16, %v204_v17 }
 0x18a   :  { %208 = vrot.lane.b32.xlu0 %v206_v18, %s691_s29 }
 0x1fc   :  { %v209_v19 = vpop.permute.xlu0 %208 }
 0x1fd   :  { %v211_v20 = vadd.f32 %v209_v19, %v111_v11 }
 0x1ff   :  { %525 = vtanh.f32 %v211_v20 }
 0x20c   :  { %v526_v24 = vpop.eup %525 }
 0x20d   :  { %215 = vrot.lane.b32.xlu1 %v526_v24, %s692_s30 }
 0x211   :  { %219 = vrot.lane.b32.xlu1 %v110_v6, %s693_s8 }
 0x27f   :  { %v216_v26 = vpop.permute.xlu1 %215 }
 0x280   :  { %v218_v29 = vmul.f32 %v216_v26, %v213_v27 }
 0x283   :  { %v220_v28 = vpop.permute.xlu1 %219 }
 0x284   :  { %v222_v30 = vmul.f32 %v524_v16, %v220_v28 }
 0x286   :  { %v223_v31 = vadd.f32 %v222_v30, %v218_v29 }
 0x288   :  { %417 = vrot.lane.b32.xlu1 %v223_v31, %s691_s29  ;;  %225 = vrot.lane.b32.xlu0 %v223_v31, %s692_s30 }
 0x2fa   :  { %v226_v32 = vpop.permute.xlu0 %225  ;;  %v418_v6 = vpop.permute.xlu1 %417 }
 0x2fb   :  { %228 = vst.msk [vmem:[#allocation2] sm:$0xff] %vm108_vm1, %v226_v32  ;;  %486 = vmatmul.mubr.msk.f32.vlgmr.msra.gmra.mxu1 %vm108_vm1, %v226_v32 }
 0x3bb   :  { %v302_v42 = vpop.f32.mrf.mxu1 }
 0x3bc   :  { %v306_v43 = vadd.f32 %v302_v42, %v229_v41 }
 0x3bd   :  { %v487_v44 = vpop.f32.mrf.mxu1 }
 0x3be   :  { %v308_v45 = vsel %vm307_vm2, %v306_v43, 0.0 }
 0x3bf   :  { %v309_v46 = vrot.slane %v308_v45, 4 }
 0x3c1   :  { %v310_v47 = vadd.f32 %v309_v46, %v308_v45 }
 0x3c3   :  { %v311_v48 = vrot.slane %v310_v47, 2 }
 0x3c5   :  { %v312_v49 = vadd.f32 %v311_v48, %v310_v47 }
 0x3c7   :  { %v313_v50 = vrot.slane %v312_v49, 1 }
 0x3c9   :  { %v314_v51 = vadd.f32 %v313_v50, %v312_v49 }
 0x3cb   :  { %v316_v52 = vmul.f32 0.125, %v314_v51 }
 0x3cd   :  { %v317_v53 = vsub.f32 %v306_v43, %v316_v52 }
 0x3cf   :  { %v318_v54 = vmul.f32 %v317_v53, %v317_v53 }
 0x3d1   :  { %v319_v55 = vsel %vm307_vm2, %v318_v54, 0.0 }
 0x3d2   :  { %v320_v56 = vrot.slane %v319_v55, 4 }
 0x3d4   :  { %v321_v57 = vadd.f32 %v320_v56, %v319_v55 }
 0x3d6   :  { %v322_v58 = vrot.slane %v321_v57, 2 }
 0x3d8   :  { %v323_v59 = vadd.f32 %v322_v58, %v321_v57 }
 0x3da   :  { %v324_v60 = vrot.slane %v323_v59, 1 }
 0x3dc   :  { %v325_v61 = vadd.f32 %v324_v60, %v323_v59 }
 0x3de   :  { %v326_v62 = vmul.f32 0.125, %v325_v61 }
 0x3e0   :  { %v327_v63 = vadd.f32 1e-05, %v326_v62 }
 0x3e2   :  { %527 = vrsqrt.f32 %v327_v63 }
 0x3ef   :  { %v528_v0 = vpop.eup %527 }
 0x3f0   :  { %v329_v1 = vmul.f32 %v528_v0, %v317_v53 }
 0x3f2   :  { %529 = vtanh.f32 %v329_v1 }
 0x3ff   :  { %v530_v2 = vpop.eup %529 }
 0x400   :  { %505 = vmatmul.mubr.msk.f32.vlgmr.msra.gmra.mxu0 %vm307_vm2, %v530_v2 }
 0x4c0   :  { %v413_v4 = vpop.f32.mrf.mxu0 }
 0x4c1   :  { %v414_v5 = vadd.f32 %v445_v3, %v413_v4 }
 0x4c2   :  { %v506_v7 = vpop.f32.mrf.mxu0 }
 0x4c3   :  { %v421_v8 = vsel %vm420_vm3, %v414_v5, %v418_v6 }
 0x4c4   :  { %422 = vst [vmem:[#allocation14] sm:$0xff] %v421_v8 }
 0x4c5   :  { %662 = shalt.err (!%p659_p6)
}
 0x4c6   :  { %432 = dma.vmem_to_hbm [thread:$0]  %s430_s12, 128, %s810_s7, [#allocation5]  }
 0x4c7   :  { %679 = dma.done.wait [#allocation5], 128  }
 0x4c8   :  { %680 = vsyncadd [#allocation5], 4294967168 }
 0x4c9   :  { %436 = vsyncpa [#allocation4], 1 }
 0x4ca   :  { %437 = vsyncpa [#allocation7], 1 }
 0x4cb   :  { %438 = vsyncpa [#allocation10], 1 }
 0x4cc   :  { %439 = vsyncpa [#allocation13], 1 }
 0x4cd   :  { %440 = vsyncpa [#allocation5], 1 }

</bundles_post_ra>
